<compile_context>
chip_gen: v5e
topology: v5e:2x2
jax: 0.10.0
libtpu: 0.0.40
codegen_flags: <defaults>
</compile_context>

<pallas_src>
import functools

import jax
import jax.numpy as jnp
from jax import lax
from jax.experimental import pallas as pl
from jax.experimental.pallas import tpu as pltpu


# --------------------------------------------------------------------------
# Stage 1: qkv projection.  bf16 MXU operands, f32 accumulation, bf16 output.
# Emits q / k / v as three (B, N, C) slabs (no downstream reshape/transpose).
# --------------------------------------------------------------------------
def _qkv_proj_kernel(x_ref, w_ref, q_ref, k_ref, v_ref):
    # x_ref: (1, tq, C) bf16
    # w_ref: (3, C, C)  bf16 -- stacked [Wq^T * scale, Wk^T, Wv^T]
    # q/k/v_ref: (1, tq, C) bf16
    x = x_ref[0]
    q_ref[0] = jnp.dot(x, w_ref[0],
                       preferred_element_type=jnp.float32).astype(q_ref.dtype)
    k_ref[0] = jnp.dot(x, w_ref[1],
                       preferred_element_type=jnp.float32).astype(k_ref.dtype)
    v_ref[0] = jnp.dot(x, w_ref[2],
                       preferred_element_type=jnp.float32).astype(v_ref.dtype)


# --------------------------------------------------------------------------
# Stage 2: flash attention (online softmax) + fused output projection.
# Heads live as static lane slices of the lane-dense (tq, C) / (tk, C) tiles.
# --------------------------------------------------------------------------
def _flash_attn_proj_kernel(q_ref, k_ref, v_ref, wp_ref, bp_ref, o_ref,
                            m_ref, l_ref, acc_ref, ctx_ref,
                            *, num_heads, head_dim):
    # q_ref: (1, tq, C) bf16 (scale pre-folded into Wq)
    # k_ref/v_ref: (1, tk, C) bf16
    # wp_ref: (C, C) bf16 (proj.weight.T, un-split) ; bp_ref: (1, C) f32
    # o_ref: (1, tq, C)
    # scratch: m/l (H, tq, 1) f32, acc (H, tq, hd) f32, ctx (tq, C) bf16
    ki = pl.program_id(2)
    nk = pl.num_programs(2)

    @pl.when(ki == 0)
    def _init():
        m_ref[...] = jnp.full_like(m_ref, -jnp.inf)
        l_ref[...] = jnp.zeros_like(l_ref)
        acc_ref[...] = jnp.zeros_like(acc_ref)

    q = q_ref[0]                                   # (tq, C) bf16
    k = k_ref[0]                                   # (tk, C) bf16
    v = v_ref[0]                                   # (tk, C) bf16

    # Static Python loop over heads: per-head 2-D MXU dots, no in-kernel
    # transposes.  TODO(synk): if H >= 12 with 256-wide tiles the bundle should
    # be checked for spills; switch to lax.fori_loop over h if spill-bound.
    for h in range(num_heads):
        sl = slice(h * head_dim, (h + 1) * head_dim)
        q_h = q[:, sl]                             # (tq, hd) bf16 (pre-scaled)
        k_h = k[:, sl]                             # (tk, hd) bf16
        v_h = v[:, sl]                             # (tk, hd) bf16

        # scores: contract hd of both operands (no explicit k transpose).
        s = lax.dot_general(q_h, k_h, (((1,), (1,)), ((), ())),
                            preferred_element_type=jnp.float32)   # (tq, tk)

        m_prev = m_ref[h]                                          # (tq, 1)
        m_new = jnp.maximum(m_prev, jnp.max(s, axis=-1, keepdims=True))
        alpha = jnp.exp(m_prev - m_new)                            # (tq, 1)
        p = jnp.exp(s - m_new)                                     # (tq, tk) f32

        l_ref[h] = alpha * l_ref[h] + jnp.sum(p, axis=-1, keepdims=True)
        acc_ref[h] = alpha * acc_ref[h] + jnp.dot(
            p.astype(v_h.dtype), v_h, preferred_element_type=jnp.float32)
        m_ref[h] = m_new

    # Epilogue on the last kv tile: normalize into a lane-dense (tq, C) bf16
    # scratch, then one full-depth (tq, C) @ (C, C) projection dot + bias.
    @pl.when(ki == nk - 1)
    def _epilogue():
        for h in range(num_heads):
            inv_l = pl.reciprocal(l_ref[h], approx=True)           # EUP, ~free
            ctx_ref[:, h * head_dim:(h + 1) * head_dim] = (
                acc_ref[h] * inv_l).astype(ctx_ref.dtype)
        y = jnp.dot(ctx_ref[...], wp_ref[...],
                    preferred_element_type=jnp.float32)             # (tq, C)
        o_ref[0] = (y + bp_ref[...]).astype(o_ref.dtype)


# --------------------------------------------------------------------------
# Wrapper
# --------------------------------------------------------------------------
def _pick_tile(n, candidates=(256, 128, 64, 32, 16, 8)):
    for t in candidates:
        if n % t == 0:
            return t
    return n          # single full-extent tile (legal: equals the array dim)


def attention_pallas(x, w_qkv, w_proj, b_proj, *, num_heads,
                     attn_mask=None, is_causal=False,
                     block_q=None, block_k=None):
    """x: (B, N, C). w_qkv: (3C, C) torch layout. w_proj: (C, C). b_proj: (C,)."""
    if attn_mask is not None or is_causal:
        # TODO(synk): attn_mask / is_causal paths not implemented (defaults only).
        raise NotImplementedError("attn_mask / is_causal not supported")

    B, N, C = x.shape
    assert C % num_heads == 0
    hd = C // num_heads
    scale = hd ** -0.5
    out_dtype = x.dtype

    # bf16 MXU operands (accumulation stays f32 via preferred_element_type).
    cdt = jnp.bfloat16
    xb = x.astype(cdt)
    # Torch qkv.weight is (3C, C); rows [0:C]=q, [C:2C]=k, [2C:3C]=v.
    # Fold the softmax scale into the q weight (free — no per-step multiply).
    wq_t = jnp.transpose(w_qkv[0 * C:1 * C]) * scale      # (C, C)
    wk_t = jnp.transpose(w_qkv[1 * C:2 * C])
    wv_t = jnp.transpose(w_qkv[2 * C:3 * C])
    w_stack = jnp.stack([wq_t, wk_t, wv_t], axis=0).astype(cdt)   # (3, C, C)
    wp_t = jnp.transpose(w_proj).astype(cdt)                      # (C, C)
    bp = b_proj.reshape(1, C).astype(jnp.float32)                 # (1, C)

    # Tile selection: 256 fills the 256-wide MXU on v6e/v7x; pass 128 on v5e.
    tq = min(block_q, N) if block_q is not None else _pick_tile(N)
    tk = min(block_k, N) if block_k is not None else _pick_tile(N)
    assert N % tq == 0 and N % tk == 0, "sequence length must be divisible by tiles"
    nq, nk = N // tq, N // tk
    # 48 MiB: under v7x's 64 MiB physical VMEM (with headroom), well inside
    # v5e/v6e's 128 MiB.
    vmem_limit = 48 * 1024 * 1024

    # ---------------- Stage 1: qkv projection ----------------
    # TODO(synk): for C >= 2048 the resident (3, C, C) bf16 weight block gets
    # large (24+ MiB); add a grid axis over the output dim with a (C, tn) block.
    q, k, v = pl.pallas_call(
        _qkv_proj_kernel,
        out_shape=(jax.ShapeDtypeStruct((B, N, C), cdt),
                   jax.ShapeDtypeStruct((B, N, C), cdt),
                   jax.ShapeDtypeStruct((B, N, C), cdt)),
        grid_spec=pltpu.PrefetchScalarGridSpec(
            num_scalar_prefetch=0,
            grid=(B, nq),
            in_specs=[
                pl.BlockSpec((1, tq, C), lambda b, i: (b, i, 0)),
                pl.BlockSpec((3, C, C), lambda b, i: (0, 0, 0)),
            ],
            out_specs=[
                pl.BlockSpec((1, tq, C), lambda b, i: (b, i, 0)),
                pl.BlockSpec((1, tq, C), lambda b, i: (b, i, 0)),
                pl.BlockSpec((1, tq, C), lambda b, i: (b, i, 0)),
            ],
        ),
        compiler_params=pltpu.CompilerParams(
            dimension_semantics=("parallel", "parallel"),
            vmem_limit_bytes=vmem_limit),
        cost_estimate=pl.CostEstimate(
            flops=2 * B * N * C * 3 * C,
            transcendentals=0,
            bytes_accessed=2 * B * N * C + 2 * 3 * C * C + 3 * 2 * B * N * C),
    )(xb, w_stack)

    # ---------------- Stage 2: flash attention + fused projection ----------------
    kernel = functools.partial(_flash_attn_proj_kernel,
                               num_heads=num_heads, head_dim=hd)
    out_itemsize = jnp.dtype(out_dtype).itemsize
    out = pl.pallas_call(
        kernel,
        out_shape=jax.ShapeDtypeStruct((B, N, C), out_dtype),
        grid_spec=pltpu.PrefetchScalarGridSpec(
            num_scalar_prefetch=0,
            grid=(B, nq, nk),
            in_specs=[
                pl.BlockSpec((1, tq, C), lambda b, qi, ki: (b, qi, 0)),
                pl.BlockSpec((1, tk, C), lambda b, qi, ki: (b, ki, 0)),
                pl.BlockSpec((1, tk, C), lambda b, qi, ki: (b, ki, 0)),
                pl.BlockSpec((C, C), lambda b, qi, ki: (0, 0)),
                pl.BlockSpec((1, C), lambda b, qi, ki: (0, 0)),
            ],
            out_specs=pl.BlockSpec((1, tq, C), lambda b, qi, ki: (b, qi, 0)),
            scratch_shapes=[
                pltpu.VMEM((num_heads, tq, 1), jnp.float32),    # running max
                pltpu.VMEM((num_heads, tq, 1), jnp.float32),    # running sum
                pltpu.VMEM((num_heads, tq, hd), jnp.float32),   # context accumulator
                pltpu.VMEM((tq, C), cdt),                       # normalized ctx (lane-dense)
            ],
        ),
        compiler_params=pltpu.CompilerParams(
            dimension_semantics=("parallel", "parallel", "arbitrary"),
            vmem_limit_bytes=vmem_limit),
        cost_estimate=pl.CostEstimate(
            flops=4 * B * num_heads * N * N * hd + 2 * B * N * C * C,
            transcendentals=B * num_heads * N * N,
            # q once, k/v re-streamed nq times, weights once, output once.
            bytes_accessed=(2 * B * N * C
                            + 2 * nq * B * N * C * 2
                            + 2 * C * C + 4 * C
                            + out_itemsize * B * N * C)),
    )(q, k, v, wp_t, bp)

    return out


# --------------------------------------------------------------------------
# Pure-JAX reference (matches the PyTorch forward: mask=None, no dropout)
# --------------------------------------------------------------------------
def attention_ref(x, w_qkv, w_proj, b_proj, *, num_heads):
    B, N, C = x.shape
    hd = C // num_heads
    scale = hd ** -0.5
    qkv = jnp.einsum('bnc,oc->bno', x, w_qkv)                   # (B, N, 3C)
    qkv = qkv.reshape(B, N, 3, num_heads, hd).transpose(2, 0, 3, 1, 4)
    q, k, v = qkv[0], qkv[1], qkv[2]                            # (B, H, N, hd)
    s = jnp.einsum('bhqd,bhkd->bhqk', q, k) * scale
    a = jax.nn.softmax(s, axis=-1)
    o = jnp.einsum('bhqk,bhkd->bhqd', a, v)
    o = o.transpose(0, 2, 1, 3).reshape(B, N, C)
    return jnp.einsum('bnc,oc->bno', o, w_proj) + b_proj


if __name__ == "__main__":
    B, N, C = 2, 16, 32
    num_heads = 8

    key = jax.random.PRNGKey(0)
    k_x, k_qkv, k_proj, k_bias = jax.random.split(key, 4)

    x = jax.random.normal(k_x, (B, N, C), dtype=jnp.float32)
    # nn.Linear(dim, 3*dim, bias=False).weight : (3C, C)
    w_qkv = jax.random.normal(k_qkv, (3 * C, C), dtype=jnp.float32) * (C ** -0.5)
    # nn.Linear(dim, dim).weight : (C, C), bias : (C,)
    w_proj = jax.random.normal(k_proj, (C, C), dtype=jnp.float32) * (C ** -0.5)
    b_proj = jax.random.normal(k_bias, (C,), dtype=jnp.float32) * 0.01

    # block_q/block_k = 8 so the small test exercises multiple q and kv tiles
    # (online-softmax path); real sizes use the 256/128 defaults.
    out = attention_pallas(x, w_qkv, w_proj, b_proj, num_heads=num_heads,
                           block_q=8, block_k=8)
    out = jax.block_until_ready(out)

    # Reference uses the same bf16-rounded operands the kernel feeds the MXU;
    # tolerance loosened for the bf16 compute path (expected, not a bug).
    xr = x.astype(jnp.bfloat16).astype(jnp.float32)
    wqr = w_qkv.astype(jnp.bfloat16).astype(jnp.float32)
    wpr = w_proj.astype(jnp.bfloat16).astype(jnp.float32)
    ref = attention_ref(xr, wqr, wpr, b_proj, num_heads=num_heads)

    assert out.shape == ref.shape
    assert jnp.allclose(out, ref, atol=1e-1, rtol=1e-1), "mismatch vs reference"

    print("KERNEL_OK")
</pallas_src>

<mosaic_0001>
module attributes {stable_mosaic.version = 11 : i64} {
  func.func @_qkv_proj_kernel(%arg0: i32, %arg1: i32, %arg2: memref<1x8x32xbf16, #tpu.memory_space<vmem>>, %arg3: memref<3x32x32xbf16, #tpu.memory_space<vmem>>, %arg4: memref<1x8x32xbf16, #tpu.memory_space<vmem>>, %arg5: memref<1x8x32xbf16, #tpu.memory_space<vmem>>, %arg6: memref<1x8x32xbf16, #tpu.memory_space<vmem>>) attributes {dimension_semantics = [#tpu.dimension_semantics<parallel>, #tpu.dimension_semantics<parallel>], iteration_bounds = array<i64: 2, 2>, scalar_prefetch = 0 : i64, scratch_operands = 0 : i64, tpu.core_type = #tpu.core_type<tc>, window_params = [{transform_indices = @transform_0, window_bounds = array<i64: 1, 8, 32>}, {pipeline_mode = #tpu.pipeline_mode<synchronous>, transform_indices = @transform_1, window_bounds = array<i64: 3, 32, 32>}, {transform_indices = @transform_2, window_bounds = array<i64: 1, 8, 32>}, {transform_indices = @transform_3, window_bounds = array<i64: 1, 8, 32>}, {transform_indices = @transform_4, window_bounds = array<i64: 1, 8, 32>}]} {
    %c0 = arith.constant 0 : index
    %c0_0 = arith.constant 0 : index
    %c0_1 = arith.constant 0 : index
    %0 = vector.load %arg2[%c0, %c0_0, %c0_1] : memref<1x8x32xbf16, #tpu.memory_space<vmem>>, vector<1x8x32xbf16>
    %1 = vector.shape_cast %0 : vector<1x8x32xbf16> to vector<8x32xbf16>
    %c0_2 = arith.constant 0 : index
    %c0_3 = arith.constant 0 : index
    %c0_4 = arith.constant 0 : index
    %2 = vector.load %arg3[%c0_2, %c0_3, %c0_4] : memref<3x32x32xbf16, #tpu.memory_space<vmem>>, vector<1x32x32xbf16>
    %3 = vector.shape_cast %2 : vector<1x32x32xbf16> to vector<32x32xbf16>
    %cst = arith.constant dense<0.000000e+00> : vector<8x32xf32>
    %4 = tpu.matmul %1, %3, %cst {dimension_numbers = #tpu.dot_dimension_numbers<[1], [0], [0], [1], [0, 0, 1, 1], [], []>} : vector<8x32xbf16>, vector<32x32xbf16>, vector<8x32xf32> -> vector<8x32xf32>
    %5 = arith.truncf %4 : vector<8x32xf32> to vector<8x32xbf16>
    %c0_5 = arith.constant 0 : index
    %c0_6 = arith.constant 0 : index
    %c0_7 = arith.constant 0 : index
    %6 = vector.load %arg4[%c0_5, %c0_6, %c0_7] : memref<1x8x32xbf16, #tpu.memory_space<vmem>>, vector<1x8x32xbf16>
    %7 = vector.shape_cast %6 : vector<1x8x32xbf16> to vector<8x32xbf16>
    %8 = vector.shape_cast %5 : vector<8x32xbf16> to vector<1x8x32xbf16>
    tpu.vector_store %arg4[%c0_5, %c0_6, %c0_7], %8 {strides = array<i32>} : memref<1x8x32xbf16, #tpu.memory_space<vmem>>, vector<1x8x32xbf16>,
    %c1 = arith.constant 1 : index
    %c0_8 = arith.constant 0 : index
    %c0_9 = arith.constant 0 : index
    %9 = vector.load %arg3[%c1, %c0_8, %c0_9] : memref<3x32x32xbf16, #tpu.memory_space<vmem>>, vector<1x32x32xbf16>
    %10 = vector.shape_cast %9 : vector<1x32x32xbf16> to vector<32x32xbf16>
    %cst_10 = arith.constant dense<0.000000e+00> : vector<8x32xf32>
    %11 = tpu.matmul %1, %10, %cst_10 {dimension_numbers = #tpu.dot_dimension_numbers<[1], [0], [0], [1], [0, 0, 1, 1], [], []>} : vector<8x32xbf16>, vector<32x32xbf16>, vector<8x32xf32> -> vector<8x32xf32>
    %12 = arith.truncf %11 : vector<8x32xf32> to vector<8x32xbf16>
    %c0_11 = arith.constant 0 : index
    %c0_12 = arith.constant 0 : index
    %c0_13 = arith.constant 0 : index
    %13 = vector.load %arg5[%c0_11, %c0_12, %c0_13] : memref<1x8x32xbf16, #tpu.memory_space<vmem>>, vector<1x8x32xbf16>
    %14 = vector.shape_cast %13 : vector<1x8x32xbf16> to vector<8x32xbf16>
    %15 = vector.shape_cast %12 : vector<8x32xbf16> to vector<1x8x32xbf16>
    tpu.vector_store %arg5[%c0_11, %c0_12, %c0_13], %15 {strides = array<i32>} : memref<1x8x32xbf16, #tpu.memory_space<vmem>>, vector<1x8x32xbf16>,
    %c2 = arith.constant 2 : index
    %c0_14 = arith.constant 0 : index
    %c0_15 = arith.constant 0 : index
    %16 = vector.load %arg3[%c2, %c0_14, %c0_15] : memref<3x32x32xbf16, #tpu.memory_space<vmem>>, vector<1x32x32xbf16>
    %17 = vector.shape_cast %16 : vector<1x32x32xbf16> to vector<32x32xbf16>
    %cst_16 = arith.constant dense<0.000000e+00> : vector<8x32xf32>
    %18 = tpu.matmul %1, %17, %cst_16 {dimension_numbers = #tpu.dot_dimension_numbers<[1], [0], [0], [1], [0, 0, 1, 1], [], []>} : vector<8x32xbf16>, vector<32x32xbf16>, vector<8x32xf32> -> vector<8x32xf32>
    %19 = arith.truncf %18 : vector<8x32xf32> to vector<8x32xbf16>
    %c0_17 = arith.constant 0 : index
    %c0_18 = arith.constant 0 : index
    %c0_19 = arith.constant 0 : index
    %20 = vector.load %arg6[%c0_17, %c0_18, %c0_19] : memref<1x8x32xbf16, #tpu.memory_space<vmem>>, vector<1x8x32xbf16>
    %21 = vector.shape_cast %20 : vector<1x8x32xbf16> to vector<8x32xbf16>
    %22 = vector.shape_cast %19 : vector<8x32xbf16> to vector<1x8x32xbf16>
    tpu.vector_store %arg6[%c0_17, %c0_18, %c0_19], %22 {strides = array<i32>} : memref<1x8x32xbf16, #tpu.memory_space<vmem>>, vector<1x8x32xbf16>,
    return
  }
  func.func @transform_0(%arg0: i32, %arg1: i32) -> (i32, i32, i32) {
    %c0_i32 = arith.constant 0 : i32
    %c0_i32_0 = arith.constant 0 : i32
    return %arg0, %arg1, %c0_i32 : i32, i32, i32
  }
  func.func @transform_1(%arg0: i32, %arg1: i32) -> (i32, i32, i32) {
    %c0_i32 = arith.constant 0 : i32
    %c0_i32_0 = arith.constant 0 : i32
    %c0_i32_1 = arith.constant 0 : i32
    %c0_i32_2 = arith.constant 0 : i32
    return %c0_i32, %c0_i32_0, %c0_i32_1 : i32, i32, i32
  }
  func.func @transform_2(%arg0: i32, %arg1: i32) -> (i32, i32, i32) {
    %c0_i32 = arith.constant 0 : i32
    %c0_i32_0 = arith.constant 0 : i32
    return %arg0, %arg1, %c0_i32 : i32, i32, i32
  }
  func.func @transform_3(%arg0: i32, %arg1: i32) -> (i32, i32, i32) {
    %c0_i32 = arith.constant 0 : i32
    %c0_i32_0 = arith.constant 0 : i32
    return %arg0, %arg1, %c0_i32 : i32, i32, i32
  }
  func.func @transform_4(%arg0: i32, %arg1: i32) -> (i32, i32, i32) {
    %c0_i32 = arith.constant 0 : i32
    %c0_i32_0 = arith.constant 0 : i32
    return %arg0, %arg1, %c0_i32 : i32, i32, i32
  }
}

</mosaic_0001>

<bundles_post_ra>
// kernel: tpu_custom_call.1
= control target key start
LH: loop header
LB: loop body
LE: loop exit
PB: predicated region body
PF: predicated region fallthrough
CT: control target
= control target key end

     0   :  { %s1250_s0 = inlined_call_operand.hbm [shape: bf16[2,16,32], index: 0, kind: input, shape index: {}]   ;;  %s1251_s1 = inlined_call_operand.hbm [shape: bf16[3,32,32], index: 1, kind: input, shape index: {}]   ;;  %s1252_s2 = inlined_call_operand.hbm [shape: bf16[2,16,32], index: 2, kind: output, shape index: {0}]   ;;  %s1253_s3 = inlined_call_operand.hbm [shape: bf16[2,16,32], index: 3, kind: output, shape index: {1}]   ;;  %s1254_s4 = inlined_call_operand.hbm [shape: bf16[2,16,32], index: 4, kind: output, shape index: {2}]  }
   0x1   :  { %1261 = sst [smem:[#allocation19_spill]] %s1251_s1 }
   0x2   :  { %1262 = sst [smem:[#allocation20_spill]] %s1254_s4 }
   0x3   :  { %10 = vsyncpa [#allocation3], 0 }
   0x4   :  { %12 = vsyncpa [#allocation3 + $0x1], 0 }
   0x5   :  { %13 = vsyncpa [#allocation6], 0 }
   0x6   :  { %14 = vsyncpa [#allocation4], 0 }
   0x7   :  { %16 = vsyncpa [#allocation4 + $0x1], 0 }
   0x8   :  { %17 = vsyncpa [#allocation9], 0 }
   0x9   :  { %19 = vsyncpa [#allocation9 + $0x1], 0  ;;  %s1007_s15 = smov 0   ;;  %s1009_s16 = smov 0  }
   0xa   :  { %s1011_s17 = smov 0   ;;  %s1013_s18 = smov 0  }
   0xb   :  { %s1015_s19 = smov 0   ;;  %s1017_s20 = smov 0  }
   0xc   :  { %s1019_s21 = smov 0   ;;  %s1021_s22 = smov 0  }
   0xd LB: > { %1263 = sst [smem:[#allocation15_spill]] %s949_s15  ;;  %s1048_s23 = sadd.s32 4294967295, %s977_s22   ;;  %s977_s22 = sphi %s1021_s22, %s25_s22   ;;  %s973_s21 = sphi %s1019_s21, %s1286_s21   ;;  %s969_s20 = sphi %s1017_s20, %s1285_s20   ;;  %s965_s19 = sphi %s1015_s19, %s1284_s19   ;;  %s961_s18 = sphi %s1013_s18, %s1283_s18   ;;  %s957_s17 = sphi %s1011_s17, %s1282_s17   ;;  %s953_s16 = sphi %s1009_s16, %s1281_s16   ;;  %s949_s15 = sphi %s1007_s15, %s1280_s15  }
   0xe   : > { %p598_p0 = scmp.ge.s32.totalorder %s977_s22, 1  ;;  %p60_p1 = scmp.eq.s32.totalorder %s1048_s23, 0 }
   0xf   : > { %p175_p2 = scmp.lt.s32.totalorder %s977_s22, 5  ;;  %s1264_s1 = sld [smem:[#allocation19_spill]] }
  0x10   : > { %s979_s28 = smov [#allocation5]   ;;  %s980_s30 = smov 64  }
  0x11   : > { %p1056_p3 = pnand %p598_p0, %p175_p2  ;;  %s188_s29 = sshll.u32 %s979_s28, 4  ;;  %s189_s29 = int_to_ptr.vmem [resolvable:$true] %s188_s29 }
  0x12   : > { %s981_s5 = smov 4   ;;  %s1255_s6 = sadd.s32 4294967294, %s977_s22  }
  0x13   : > { %p666_p4 = pneg %p1056_p3  ;;  %s34_s7 = sadd.s32 1, %s969_s20 }
  0x14   : > { %s37_s8 = sadd.s32 1, %s973_s21  ;;  %p35_p6 = scmp.ge.s32.totalorder %s34_s7, 2 }
  0x15   : > { %s186_s26 = sshll.u32 %s1264_s1, 4  ;;  %p667_p5 = pnand %p666_p4, %p60_p1  ;;  %s187_s26 = int_to_ptr.hbm [resolvable:$true] %s186_s26 }
  0x16   : > { %s46_s9 = sadd.s32 1, %s957_s17  ;;  %p53_p7 = scmp.ne.s32.totalorder %s957_s17, %s953_s16 }
  0x17   : > { %669 = dma.hbm_to_vmem [thread:$0]  (!%p667_p5), %s187_s26, 768, %s189_s29, [#allocation6], %s980_s30, %s980_s30, %s981_s5  }
  0x18   : > { %p54_p8 = scmp.eq.s32.totalorder %s977_s22, 0  ;;  %s1288_s7 = smov (%p35_p6, %s34_s7), 0 }
  0x19   : > { %1266 = sst [smem:[#allocation16_spill]] %s1288_s7  ;;  %s1290_s8 = smov (!%p35_p6, %s37_s8), %s973_s21 }
  0x1a   : > { %s42_s10 = ssub.s32 %s969_s20, %s1288_s7  ;;  %p1076_p9 = por %p54_p8, %p53_p7 }
  0x1b   : > { %p39_p10 = scmp.ge.s32.totalorder %s1290_s8, 2  ;;  %p59_p11 = scmp.ne.s32.totalorder %s953_s16, %s949_s15 }
  0x1c   : > { %p106_p12 = scmp.eq.s32.totalorder %s1048_s23, 3  ;;  %p112_p13 = scmp.eq.s32.totalorder %s1255_s6, 3 }
  0x1d   : > { %s1292_s8 = smov (%p39_p10, %s1290_s8), 0  ;;  %p1089_p0 = por %p60_p1, %p59_p11 }
  0x1e   : > { %1268 = sst [smem:[#allocation17_spill]] %s1292_s8  ;;  %p1093_p2 = por %p106_p12, %p53_p7 }
  0x1f   : > { %s41_s14 = ssub.s32 %s973_s21, %s1292_s8  ;;  %p1099_p4 = por %p112_p13, %p59_p11 }
  0x20   : > { %s43_s25 = sor.u32 %s42_s10, %s41_s14  ;;  %p685_p5 = scmp.lt.s32.totalorder %s977_s22, 4 }
  0x21   : > { %s1271_s24 = scalar_select %p1099_p4, 1, 0 }
  0x22   : > { %p44_p6 = scmp.eq.s32.totalorder %s43_s25, 0  ;;  %s202_s26 = sand.u32 1, %s957_s17  }
  0x23   : > { %1272 = sst [smem:[#allocation18_spill]] %s1271_s24  ;;  %s601_s28 = sshll.u32 %s202_s26, 2 }
  0x24   : > { %s1106_s29 = scalar_select %p44_p6, %s957_s17, %s46_s9  }
  0x25   : > { %s602_s30 = sshll.u32 %s973_s21, 1  ;;  %s206_s6 = scalar_lea.vmem [#allocation2], %s601_s28 }
  0x26   : > { %s210_s5 = sadd.s32 %s969_s20, %s602_s30  ;;  %s216_s1 = sshll.u32 %s206_s6, 4  ;;  %s217_s1 = int_to_ptr.vmem [resolvable:$true] %s216_s1 }
  0x27   : > { %s603_s7 = sshll.u32 %s210_s5, 2  ;;  %p671_p7 = pnand %p685_p5, %p1076_p9 }
  0x28   : > { %s212_s8 = scalar_lea.hbm %s1250_s0, %s603_s7  ;;  %s203_s10 = scalar_lea.sflag [#allocation3], %s202_s26 }
  0x29   : > { %s214_s24 = sshll.u32 %s212_s8, 4  ;;  %225 = sbr.rel (%p1056_p3) target bundleno = 212 (0xd4), region = 28  ;;  %s215_s24 = int_to_ptr.hbm [resolvable:$true] %s214_s24 }
  0x2a   : > { %673 = dma.hbm_to_vmem [thread:$0]  (!%p671_p7), %s215_s24, 64, %s217_s1, %s203_s10  }
  0x2b   : > { %s1118_s9 = sand.u32 (!%p1056_p3), 1, %s953_s16  }
  0x2c   : > { %s1121_s6 = sshll.u32 (!%p1056_p3), %s1118_s9, 2  ;;  %s228_s4 = scalar_lea.sflag (!%p1056_p3), [#allocation3], %s1118_s9 }
  0x2d   : > { %s231_s15 = scalar_lea.vmem (!%p1056_p3), [#allocation2], %s1121_s6 }
  0x2e   : > { %932 = dma.done.wait (%p1089_p0), %s228_s4, 64  }
  0x2f   : > { %934 = vsyncadd (%p1089_p0), %s228_s4, 4294967232 }
  0x30   : > { %936 = dma.done.wait (%p60_p1), [#allocation6], 768  }
  0x31   : > { %938 = vsyncadd (%p60_p1), [#allocation6], 4294966528  ;;  %v649_v0 = vld [vmem:[#allocation5 + $0x8] sm:$0xff]  ;;  %v651_v1 = vld [vmem:[#allocation5 + $0x18] sm:$0xff]  ;;  %vm290_vm0 = vcmask 261120   ;;  %s640_s1 = sshll.u32 %s965_s19, 1 }
  0x32   : > { %v653_v2 = vld [vmem:[#allocation5 + $0x28] sm:$0xff]  ;;  %300 = vmatpush.bf16.msra.mxu0 %v649_v0  ;;  %333 = vmatpush.bf16.msra.mxu1 %v651_v1  ;;  %v648_v3 = vld [vmem:[#allocation5] sm:$0xff]  ;;  %v650_v4 = vld [vmem:[#allocation5 + $0x10] sm:$0xff]  ;;  %s395_s27 = sadd.s32 %s961_s18, %s640_s1  ;;  %s379_s14 = sand.u32 1, %s1048_s23   ;;  %vm308_vm1 = vcmask 257024  }
  0x33   : > { %365 = vmatpush.bf16.msra.mxu2 %v653_v2  ;;  %v652_v5 = vld [vmem:[#allocation5 + $0x20] sm:$0xff]  ;;  %v273_v6 = vld [vmem:[%s231_s15] sm:$0xf]  ;;  %s641_s7 = sshll.u32 %s395_s27, 2  ;;  %s264_s24 = scalar_lea.vmem [#allocation8], %s1121_s6 }
  0x34   : > { %s413_s12 = scalar_lea.hbm %s1253_s3, %s641_s7  ;;  %s1140_s25 = sshll.u32 %s264_s24, 4  ;;  %s416_s25 = int_to_ptr.vmem [resolvable:$true] %s1140_s25 }
  0x35   : > { %s397_s30 = scalar_lea.hbm %s1252_s2, %s641_s7  ;;  %s1145_s5 = sshll.u32 %s413_s12, 4  ;;  %s418_s5 = int_to_ptr.hbm [resolvable:$true] %s1145_s5 }
  0x36   : > { %301 = vmatpush.bf16.msra.mxu0 %v648_v3  ;;  %334 = vmatpush.bf16.msra.mxu1 %v650_v4  ;;  %s257_s18 = scalar_lea.vmem [#allocation7], %s1121_s6  ;;  %s1153_s23 = sshll.u32 %s397_s30, 4  ;;  %s402_s23 = int_to_ptr.hbm [resolvable:$true] %s1153_s23 }
  0x37   : > { %366 = vmatpush.bf16.msra.mxu2 %v652_v5  ;;  %s1150_s19 = sshll.u32 %s257_s18, 4  ;;  %s1273_s15 = sld [smem:[#allocation20_spill]]  ;;  %s400_s19 = int_to_ptr.vmem [resolvable:$true] %s1150_s19 }
  0x38   : > { %s271_s8 = scalar_lea.vmem [#allocation10], %s1121_s6  ;;  %s1169_s26 = scalar_lea.sflag [#allocation9], %s379_s14 }
  0x39   : > { %618 = vmatmul.msk.bf16.vlgmr.msra.gmra.mxu0 %vm290_vm0, %v273_v6  ;;  %627 = vmatmul.msk.bf16.vlgmr.msra.gmra.mxu1 %vm290_vm0, %v273_v6  ;;  %s1165_s11 = sshll.u32 %s271_s8, 4  ;;  %s829_s28 = sshra.s32 %s418_s5, 4  ;;  %s830_s28 = int_to_ptr.hbm [resolvable:$true] %s829_s28  ;;  %s432_s11 = int_to_ptr.vmem [resolvable:$true] %s1165_s11 }
  0x3a   : > { %636 = vmatmul.msk.bf16.vlgmr.msra.gmra.mxu2 %vm290_vm0, %v273_v6  ;;  %s831_s30 = scalar_lea.hbm %s830_s28, 4  ;;  %s835_s4 = scalar_lea.hbm %s1253_s3, 16 }
  0x3b   : > { %p832_p1 = scmp.ne.s32.totalorder %s830_s28, %s831_s30  ;;  %p836_p9 = scmp.lt.s32.totalorder %s830_s28, %s1253_s3 }
  0x3c   : > { %p837_p10 = scmp.lt.s32.totalorder %s835_s4, %s831_s30 }
  0x3d   : > { %s1274_s1 = smov %s1273_s15  ;;  %s429_s27 = scalar_lea.hbm %s1273_s15, %s641_s7 }
  0x3e   : > { %s1167_s12 = sshll.u32 %s429_s27, 4  ;;  %p833_p3 = pnand %p832_p1, %p1093_p2  ;;  %s434_s12 = int_to_ptr.hbm [resolvable:$true] %s1167_s12 }
  0x3f   : > { %p838_p11 = por %p837_p10, %p836_p9 }
  0x40   : > { %p834_p8 = pneg %p833_p3 }
  0x42   : > { %p839_p12 = pnand %p838_p11, %p834_p8 }
  0xb6   : > { %v303_v7 = vpop.f32.mrf.mxu0  ;;  %v336_v8 = vpop.f32.mrf.mxu1 }
  0xb7   : > { %v307_v9 = vpack.c.bf16 %v303_v7, %v303_v7  ;;  %v340_v10 = vpack.c.bf16 %v336_v8, %v336_v8 }
  0xb9   : > { %341 = vst.msk [vmem:[%s264_s24] sm:$0xf] %vm308_vm1, %v340_v10 }
  0xba   : > { %842 = shalt.err (!%p839_p12)
}
  0xbb   : > { %661 = dma.vmem_to_hbm [thread:$0]  (%p1093_p2), %s416_s25, 64, %s418_s5, %s1169_s26   ;;  %309 = vst.msk [vmem:[%s257_s18] sm:$0xf] %vm308_vm1, %v307_v9 }
  0xbc   : > { %s375_s14 = scalar_lea.sflag [#allocation4], %s1118_s9  ;;  %s857_s27 = sshra.s32 %s402_s23, 4  ;;  %s858_s27 = int_to_ptr.hbm [resolvable:$true] %s857_s27 }
  0xbd   : > { %s859_s28 = scalar_lea.hbm %s858_s27, 4  ;;  %s863_s10 = scalar_lea.hbm %s1252_s2, 16 }
  0xbe   : > { %p860_p13 = scmp.ne.s32.totalorder %s858_s27, %s859_s28  ;;  %p864_p6 = scmp.lt.s32.totalorder %s858_s27, %s1252_s2 }
  0xbf   : > { %p865_p7 = scmp.lt.s32.totalorder %s863_s10, %s859_s28 }
  0xc0   : > { %p861_p0 = pnand %p860_p13, %p1093_p2 }
  0xc1   : > { %p866_p1 = por %p865_p7, %p864_p6 }
  0xc2   : > { %p862_p5 = pneg %p861_p0 }
  0xc4   : > { %p867_p3 = pnand %p866_p1, %p862_p5 }
  0xc6   : > { %870 = shalt.err (!%p867_p3)
}
  0xc7   : > { %660 = dma.vmem_to_hbm [thread:$0]  (%p1093_p2), %s400_s19, 64, %s402_s23, %s375_s14   ;;  %v368_v11 = vpop.f32.mrf.mxu2  ;;  %v305_v13 = vpop.f32.mrf.mxu0 }
  0xc8   : > { %v372_v12 = vpack.c.bf16 %v368_v11, %v368_v11  ;;  %v338_v14 = vpop.f32.mrf.mxu1  ;;  %s885_s9 = sshra.s32 %s434_s12, 4  ;;  %s891_s19 = scalar_lea.hbm %s1274_s1, 16  ;;  %s886_s9 = int_to_ptr.hbm [resolvable:$true] %s885_s9 }
  0xc9   : > { %s887_s25 = scalar_lea.hbm %s886_s9, 4  ;;  %p892_p11 = scmp.lt.s32.totalorder %s886_s9, %s1274_s1 }
  0xca   : > { %373 = vst.msk [vmem:[%s271_s8] sm:$0xf] %vm308_vm1, %v372_v12  ;;  %p888_p8 = scmp.ne.s32.totalorder %s886_s9, %s887_s25  ;;  %p893_p12 = scmp.lt.s32.totalorder %s891_s19, %s887_s25 }
  0xcc   : > { %p889_p9 = pnand %p888_p8, %p1093_p2  ;;  %p894_p13 = por %p893_p12, %p892_p11 }
  0xce   : > { %p890_p10 = pneg %p889_p9 }
  0xd0   : > { %p895_p0 = pnand %p894_p13, %p890_p10 }
  0xd2   : > { %898 = shalt.err (!%p895_p0)
}
  0xd3   : > { %662 = dma.vmem_to_hbm [thread:$0]  (%p1093_p2), %s432_s11, 64, %s434_s12, %s1169_s26   ;;  %v370_v15 = vpop.f32.mrf.mxu2 }
  0xd4 PF: > { %s1275_s6 = sld [smem:[#allocation15_spill]]  ;;  %p687_p5 = scmp.ge.s32.totalorder %s977_s22, 2 }
  0xd6   : > { %p675_p6 = pnand %p687_p5, %p1099_p4 }
  0xd8   : > { %p676_p7 = pneg %p675_p6 }
  0xda   : > { %s445_s14 = sand.u32 1, %s1275_s6  }
  0xdb   : > { %s446_s27 = scalar_lea.sflag [#allocation4], %s445_s14 }
  0xdc   : > { %940 = dma.done.wait (%p676_p7), %s446_s27, 64  }
  0xdd   : > { %942 = vsyncadd (%p676_p7), %s446_s27, 4294967232  ;;  %s1277_s28 = sadd.s32 4294967294, %s977_s22  }
  0xde   : > { %s455_s30 = sand.u32 1, %s1277_s28  }
  0xdf   : > { %s456_s7 = scalar_lea.sflag [#allocation9], %s455_s30 }
  0xe0   : > { %944 = dma.done.wait (%p676_p7), %s456_s7, 128  }
  0xe1   : > { %946 = vsyncadd (%p676_p7), %s456_s7, 4294967168  ;;  %s25_s22 = sadd.s32 1, %s977_s22   ;;  %s1278_s13 = sld [smem:[#allocation16_spill]] }
  0xe2   : > { %p22_p2 = scmp.ge.s32.totalorder %s25_s22, 6   ;;  %s1279_s11 = sld [smem:[#allocation17_spill]] }
  0xe3   : > { %s1280_s15 = smov %s953_s16  ;;  %s1281_s16 = smov %s957_s17 }
  0xe4   : > { %s1282_s17 = smov %s1106_s29  ;;  %s1283_s18 = smov %s969_s20 }
  0xe5   : > { %s1284_s19 = smov %s973_s21  ;;  %24 = sbr.rel (!%p22_p2) target bundleno = 13 (0xd), region = 111 }
  0xe7   : > { %s1285_s20 = smov %s1278_s13 }
  0xe8   : > { %s1286_s21 = smov %s1279_s11 }
  0xea   :  { %472 = vsyncpa [#allocation3], 1 }
  0xeb   :  { %474 = vsyncpa [#allocation3 + $0x1], 1 }
  0xec   :  { %475 = vsyncpa [#allocation6], 1 }
  0xed   :  { %476 = vsyncpa [#allocation4], 1 }
  0xee   :  { %478 = vsyncpa [#allocation4 + $0x1], 1 }
  0xef   :  { %479 = vsyncpa [#allocation9], 1 }
  0xf0   :  { %481 = vsyncpa [#allocation9 + $0x1], 1 }

</bundles_post_ra>
